<compile_context>
chip_gen: v6e
topology: v6e:2x2x1
jax: 0.10.0
libtpu: 0.0.40
codegen_flags: <defaults>
</compile_context>

<pallas_src>
import jax
import jax.numpy as jnp
import numpy as np
from jax.experimental import pallas as pl
from jax.experimental.pallas import tpu as pltpu


def _conv3x3_prelu_kernel(alpha_ref, x_ref, wb_ref, b_ref, o_ref):
    # alpha_ref: (1, 1)                  PReLU slope (SMEM scalar)
    # x_ref:     (1, H+2, (W+2)*Ci)      zero-padded input rows, one batch element
    # wb_ref:    (3, (W+2)*Ci, W*Co)     banded weights, one band per ky
    # b_ref:     (1, W*Co)               bias pre-tiled over W (permuted channel order)
    # o_ref:     (1, H, W*Co)            conv+bias+PReLU output (lane-dense)
    H = o_ref.shape[1]

    x = x_ref[0]  # (H+2, (W+2)*Ci)

    # 3 banded matmuls (one per kernel row); pure sublane-offset slices, no lane repack.
    acc = jnp.dot(x[0:H, :], wb_ref[0], preferred_element_type=jnp.float32)
    acc = acc + jnp.dot(x[1:H + 1, :], wb_ref[1], preferred_element_type=jnp.float32)
    acc = acc + jnp.dot(x[2:H + 2, :], wb_ref[2], preferred_element_type=jnp.float32)
    acc = acc + b_ref[...]  # broadcast (1, W*Co)

    # PReLU (single shared parameter): max(0,x) + a*min(0,x)
    a = alpha_ref[0, 0]
    y = jnp.where(acc >= 0, acc, a * acc)
    o_ref[0] = y.astype(o_ref.dtype)


def pixel_shuffle_forward(x_nchw, weight_oihw, bias, alpha, upscale_factor):
    """Equivalent of PixelShuffle.forward for NCHW input x."""
    N, Ci, H, W = x_nchw.shape
    Co = weight_oihw.shape[0]
    r = upscale_factor
    assert Co % (r * r) == 0
    C2 = Co // (r * r)

    # ---- input layout glue: NCHW -> NHWC, zero-pad, flatten each padded row ----
    x_nhwc = jnp.transpose(x_nchw, (0, 2, 3, 1))
    x_pad = jnp.pad(x_nhwc, ((0, 0), (1, 1), (1, 1), (0, 0)))
    x_rows = x_pad.reshape(N, H + 2, (W + 2) * Ci)

    # ---- weight prep (done once): HWIO, permute Co to (ry, rx, c2), build bands ----
    w_hwio = jnp.transpose(weight_oihw, (2, 3, 1, 0)).astype(jnp.float32)  # (3,3,Ci,Co)
    # column j = ry*(r*C2) + rx*C2 + c2  maps to original co = c2*r*r + ry*r + rx
    colperm = np.arange(Co).reshape(C2, r, r).transpose(1, 2, 0).reshape(-1)
    w_perm = w_hwio[:, :, :, colperm]                                       # (3,3,Ci,Co)

    # shift matrices S[kx, wx, w] = 1 iff wx == w + kx  (constant, numpy)
    S = np.zeros((3, W + 2, W), np.float32)
    for kx in range(3):
        S[kx, kx + np.arange(W), np.arange(W)] = 1.0
    # band[ky, wx, ci, w, co] = w_perm[ky, wx-w, ci, co] for 0 <= wx-w <= 2 else 0
    band = jnp.einsum('ykic,kab->yaibc', w_perm, jnp.asarray(S))
    band = band.reshape(3, (W + 2) * Ci, W * Co)

    b_row = jnp.tile(bias.astype(jnp.float32)[colperm], W).reshape(1, W * Co)
    a2 = jnp.asarray(alpha, jnp.float32).reshape(1, 1)

    conv_rows = pl.pallas_call(
        _conv3x3_prelu_kernel,
        out_shape=jax.ShapeDtypeStruct((N, H, W * Co), x_nchw.dtype),
        grid=(N,),
        in_specs=[
            pl.BlockSpec(memory_space=pltpu.MemorySpace.SMEM),                 # alpha
            pl.BlockSpec((1, H + 2, (W + 2) * Ci), lambda n: (n, 0, 0)),       # x rows
            pl.BlockSpec((3, (W + 2) * Ci, W * Co), lambda n: (0, 0, 0)),      # banded w
            pl.BlockSpec((1, W * Co), lambda n: (0, 0)),                       # bias row
        ],
        out_specs=pl.BlockSpec((1, H, W * Co), lambda n: (n, 0, 0)),
        compiler_params=pltpu.CompilerParams(
            dimension_semantics=("parallel",)),
    )(a2, x_rows, band, b_row)

    # ---- PixelShuffle glue: channel order in kernel output is (ry, rx, c2) ----
    y = conv_rows.reshape(N, H, W, r, r, C2)        # n, h, w, ry, rx, c2
    y = jnp.transpose(y, (0, 1, 3, 2, 4, 5))        # n, h, ry, w, rx, c2  (lane dims untouched)
    y = y.reshape(N, H * r, W * r, C2)              # upscaled NHWC
    return jnp.transpose(y, (0, 3, 1, 2))           # NCHW


def _reference(x, weight, bias, alpha, r):
    conv = jax.lax.conv_general_dilated(
        x, weight, window_strides=(1, 1), padding=((1, 1), (1, 1)),
        dimension_numbers=("NCHW", "OIHW", "NCHW"))
    conv = conv + bias.reshape(1, -1, 1, 1)
    N, Co, H, W = conv.shape
    C2 = Co // (r * r)
    y = conv.reshape(N, C2, r, r, H, W).transpose(0, 1, 4, 2, 5, 3)
    y = y.reshape(N, C2, H * r, W * r)
    return jnp.where(y >= 0, y, alpha * y)


if __name__ == "__main__":
    in_channels, out_channels, upscale_factor = 4, 16, 2
    N, H, W = 2, 16, 16

    key = jax.random.PRNGKey(0)
    kx, kw, kb = jax.random.split(key, 3)
    x = jax.random.normal(kx, (N, in_channels, H, W), dtype=jnp.float32)
    # Deterministic synthetic parameters (Conv2d: weight (Co, Ci, 3, 3), bias (Co,))
    weight = 0.1 * jax.random.normal(
        kw, (out_channels, in_channels, 3, 3), dtype=jnp.float32)
    bias = 0.1 * jax.random.normal(kb, (out_channels,), dtype=jnp.float32)
    alpha = jnp.array(0.25, dtype=jnp.float32)  # nn.PReLU() default init

    out = pixel_shuffle_forward(x, weight, bias, alpha, upscale_factor)
    out = jax.block_until_ready(out)

    ref = _reference(x, weight, bias, alpha, upscale_factor)
    assert out.shape == (N, out_channels // (upscale_factor ** 2),
                         H * upscale_factor, W * upscale_factor)
    np.testing.assert_allclose(np.asarray(out), np.asarray(ref),
                               rtol=1e-4, atol=1e-4)
    print("KERNEL_OK")
</pallas_src>

<mosaic_0001>
module attributes {stable_mosaic.version = 11 : i64} {
  func.func @_conv3x3_prelu_kernel(%arg0: i32, %arg1: memref<1x1xf32, #tpu.memory_space<smem>>, %arg2: memref<1x18x72xf32, #tpu.memory_space<vmem>>, %arg3: memref<3x72x256xf32, #tpu.memory_space<vmem>>, %arg4: memref<1x256xf32, #tpu.memory_space<vmem>>, %arg5: memref<1x16x256xf32, #tpu.memory_space<vmem>>) attributes {dimension_semantics = [#tpu.dimension_semantics<parallel>], iteration_bounds = array<i64: 2>, scalar_prefetch = 0 : i64, scratch_operands = 0 : i64, tpu.core_type = #tpu.core_type<tc>, window_params = [{transform_indices = @transform_0, window_bounds = array<i64: 1, 1>}, {transform_indices = @transform_1, window_bounds = array<i64: 1, 18, 72>}, {pipeline_mode = #tpu.pipeline_mode<synchronous>, transform_indices = @transform_2, window_bounds = array<i64: 3, 72, 256>}, {pipeline_mode = #tpu.pipeline_mode<synchronous>, transform_indices = @transform_3, window_bounds = array<i64: 1, 256>}, {transform_indices = @transform_4, window_bounds = array<i64: 1, 16, 256>}]} {
    %c0 = arith.constant 0 : index
    %c0_0 = arith.constant 0 : index
    %c0_1 = arith.constant 0 : index
    %0 = vector.load %arg2[%c0, %c0_0, %c0_1] : memref<1x18x72xf32, #tpu.memory_space<vmem>>, vector<1x18x72xf32>
    %1 = vector.shape_cast %0 : vector<1x18x72xf32> to vector<18x72xf32>
    %2 = vector.extract_strided_slice %1 {offsets = [0, 0], sizes = [16, 72], strides = [1, 1]} : vector<18x72xf32> to vector<16x72xf32>
    %c0_2 = arith.constant 0 : index
    %c0_3 = arith.constant 0 : index
    %c0_4 = arith.constant 0 : index
    %3 = vector.load %arg3[%c0_2, %c0_3, %c0_4] : memref<3x72x256xf32, #tpu.memory_space<vmem>>, vector<1x72x256xf32>
    %4 = vector.shape_cast %3 : vector<1x72x256xf32> to vector<72x256xf32>
    %cst = arith.constant dense<0.000000e+00> : vector<16x256xf32>
    %5 = tpu.matmul %2, %4, %cst {dimension_numbers = #tpu.dot_dimension_numbers<[1], [0], [0], [1], [0, 0, 1, 1], [], []>} : vector<16x72xf32>, vector<72x256xf32>, vector<16x256xf32> -> vector<16x256xf32>
    %6 = vector.extract_strided_slice %1 {offsets = [1, 0], sizes = [16, 72], strides = [1, 1]} : vector<18x72xf32> to vector<16x72xf32>
    %c1 = arith.constant 1 : index
    %c0_5 = arith.constant 0 : index
    %c0_6 = arith.constant 0 : index
    %7 = vector.load %arg3[%c1, %c0_5, %c0_6] : memref<3x72x256xf32, #tpu.memory_space<vmem>>, vector<1x72x256xf32>
    %8 = vector.shape_cast %7 : vector<1x72x256xf32> to vector<72x256xf32>
    %cst_7 = arith.constant dense<0.000000e+00> : vector<16x256xf32>
    %9 = tpu.matmul %6, %8, %cst_7 {dimension_numbers = #tpu.dot_dimension_numbers<[1], [0], [0], [1], [0, 0, 1, 1], [], []>} : vector<16x72xf32>, vector<72x256xf32>, vector<16x256xf32> -> vector<16x256xf32>
    %10 = arith.addf %5, %9 : vector<16x256xf32>
    %11 = vector.extract_strided_slice %1 {offsets = [2, 0], sizes = [16, 72], strides = [1, 1]} : vector<18x72xf32> to vector<16x72xf32>
    %c2 = arith.constant 2 : index
    %c0_8 = arith.constant 0 : index
    %c0_9 = arith.constant 0 : index
    %12 = vector.load %arg3[%c2, %c0_8, %c0_9] : memref<3x72x256xf32, #tpu.memory_space<vmem>>, vector<1x72x256xf32>
    %13 = vector.shape_cast %12 : vector<1x72x256xf32> to vector<72x256xf32>
    %cst_10 = arith.constant dense<0.000000e+00> : vector<16x256xf32>
    %14 = tpu.matmul %11, %13, %cst_10 {dimension_numbers = #tpu.dot_dimension_numbers<[1], [0], [0], [1], [0, 0, 1, 1], [], []>} : vector<16x72xf32>, vector<72x256xf32>, vector<16x256xf32> -> vector<16x256xf32>
    %15 = arith.addf %10, %14 : vector<16x256xf32>
    %c0_11 = arith.constant 0 : index
    %c0_12 = arith.constant 0 : index
    %16 = vector.load %arg4[%c0_11, %c0_12] : memref<1x256xf32, #tpu.memory_space<vmem>>, vector<1x256xf32>
    %17 = vector.broadcast %16 : vector<1x256xf32> to vector<16x256xf32>
    %18 = arith.addf %15, %17 : vector<16x256xf32>
    %c0_13 = arith.constant 0 : index
    %c0_14 = arith.constant 0 : index
    %19 = memref.load %arg1[%c0_13, %c0_14] : memref<1x1xf32, #tpu.memory_space<smem>>
    %cst_15 = arith.constant 0.000000e+00 : f32
    %20 = vector.broadcast %cst_15 : f32 to vector<16x256xf32>
    %21 = arith.cmpf oge, %18, %20 : vector<16x256xf32>
    %22 = vector.broadcast %19 : f32 to vector<16x256xf32>
    %23 = arith.mulf %22, %18 : vector<16x256xf32>
    %24 = arith.select %21, %18, %23 : vector<16x256xi1>, vector<16x256xf32>
    %c0_16 = arith.constant 0 : index
    %c0_17 = arith.constant 0 : index
    %c0_18 = arith.constant 0 : index
    %25 = vector.load %arg5[%c0_16, %c0_17, %c0_18] : memref<1x16x256xf32, #tpu.memory_space<vmem>>, vector<1x16x256xf32>
    %26 = vector.shape_cast %25 : vector<1x16x256xf32> to vector<16x256xf32>
    %27 = vector.shape_cast %24 : vector<16x256xf32> to vector<1x16x256xf32>
    tpu.vector_store %arg5[%c0_16, %c0_17, %c0_18], %27 {strides = array<i32>} : memref<1x16x256xf32, #tpu.memory_space<vmem>>, vector<1x16x256xf32>,
    return
  }
  func.func @transform_0(%arg0: i32) -> (i32, i32) {
    %c0_i32 = arith.constant 0 : i32
    %c0_i32_0 = arith.constant 0 : i32
    %c0_i32_1 = arith.constant 0 : i32
    return %c0_i32, %c0_i32_0 : i32, i32
  }
  func.func @transform_1(%arg0: i32) -> (i32, i32, i32) {
    %c0_i32 = arith.constant 0 : i32
    %c0_i32_0 = arith.constant 0 : i32
    %c0_i32_1 = arith.constant 0 : i32
    return %arg0, %c0_i32, %c0_i32_0 : i32, i32, i32
  }
  func.func @transform_2(%arg0: i32) -> (i32, i32, i32) {
    %c0_i32 = arith.constant 0 : i32
    %c0_i32_0 = arith.constant 0 : i32
    %c0_i32_1 = arith.constant 0 : i32
    %c0_i32_2 = arith.constant 0 : i32
    return %c0_i32, %c0_i32_0, %c0_i32_1 : i32, i32, i32
  }
  func.func @transform_3(%arg0: i32) -> (i32, i32) {
    %c0_i32 = arith.constant 0 : i32
    %c0_i32_0 = arith.constant 0 : i32
    %c0_i32_1 = arith.constant 0 : i32
    return %c0_i32, %c0_i32_0 : i32, i32
  }
  func.func @transform_4(%arg0: i32) -> (i32, i32, i32) {
    %c0_i32 = arith.constant 0 : i32
    %c0_i32_0 = arith.constant 0 : i32
    %c0_i32_1 = arith.constant 0 : i32
    return %arg0, %c0_i32, %c0_i32_0 : i32, i32, i32
  }
}

</mosaic_0001>

<bundles_post_ra>
// kernel: tpu_custom_call.1
= control target key start
LH: loop header
LB: loop body
LE: loop exit
PB: predicated region body
PF: predicated region fallthrough
CT: control target
= control target key end

     0   :  { %s1036_s0 = inlined_call_operand.<no memory space> [shape: f32[1,1], index: 0, kind: input, shape index: {}]   ;;  %s1037_s1 = inlined_call_operand.vmem [shape: f32[2,18,72], index: 1, kind: input, shape index: {}]   ;;  %s1038_s2 = inlined_call_operand.hbm [shape: f32[3,72,256], index: 2, kind: input, shape index: {}]   ;;  %s1039_s3 = inlined_call_operand.vmem [shape: f32[1,256], index: 3, kind: input, shape index: {}]   ;;  %s1040_s4 = inlined_call_operand.hbm [shape: f32[2,16,256], index: 4, kind: output, shape index: {}]  }
   0x1   :  { %9 = sst [smem:[#allocation2]] %s1036_s0 }
   0x2   :  { %10 = vsyncpa [#allocation4], 0 }
   0x3   :  { %11 = vsyncpa [#allocation5], 0 }
   0x4   :  { %13 = vsyncpa [#allocation5 + $0x1], 0  ;;  %s877_s17 = smov 0   ;;  %s879_s18 = smov 0  }
   0x5   :  { %s881_s19 = smov 0   ;;  %s883_s20 = smov 0  }
   0x6 LB: > { %s898_s0 = sadd.s32 4294967295, %s840_s20   ;;  %s656_s21 = sadd.s32 4294967294, %s840_s20   ;;  %s840_s20 = sphi %s883_s20, %s1048_s20   ;;  %s836_s19 = sphi %s881_s19, %s1047_s19   ;;  %s832_s18 = sphi %s879_s18, %s1046_s18   ;;  %s828_s17 = sphi %s877_s17, %s1045_s17  }
   0x7   : > { %s902_s22 = sadd.s32 1, %s840_s20   ;;  %s115_s23 = sadd.s32 1, %s836_s19 }
   0x8   : > { %s112_s24 = ssub.s32 %s840_s20, %s902_s22  ;;  %p125_p0 = scmp.ne.s32.totalorder %s836_s19, %s832_s18 }
   0x9   : > { %p113_p1 = scmp.eq.s32.totalorder %s112_s24, 0  ;;  %p126_p2 = scmp.eq.s32.totalorder %s898_s0, 1 }
   0xa   : > { %p131_p3 = scmp.ne.s32.totalorder %s832_s18, %s828_s17  ;;  %p132_p4 = scmp.eq.s32.totalorder %s656_s21, 1 }
   0xb   : > { %s913_s25 = scalar_select %p113_p1, %s836_s19, %s115_s23  }
   0xc   : > { %p915_p5 = por %p126_p2, %p125_p0  ;;  %p919_p6 = por %p132_p4, %p131_p3 }
   0xd   : > { %p657_p7 = scmp.ge.s32.totalorder %s840_s20, 1  ;;  %p139_p8 = scmp.lt.s32.totalorder %s840_s20, 3 }
   0xe   : > { %s1042_s27 = scalar_select %p919_p6, 1, 0 }
   0xf   : > { %p709_p9 = scmp.eq.s32.totalorder %s898_s0, 0  ;;  %p926_p10 = pnand %p657_p7, %p139_p8 }
  0x10   : > { %s842_s29 = smov [#allocation3]  }
  0x11   : > { %s154_s30 = sshll.u32 %s842_s29, 4  ;;  %p701_p11 = pneg %p926_p10  ;;  %s155_s30 = int_to_ptr.vmem [resolvable:$true] %s154_s30 }
  0x12   : > { %s761_s5 = scalar_lea.vmem %s155_s30, 6912  ;;  %p769_p3 = scmp.lt.s32.totalorder %s155_s30, %s155_s30 }
  0x13   : > { %p702_p12 = pnand %p709_p9, %p701_p11  ;;  %p762_p0 = scmp.ne.s32.totalorder %s155_s30, %s761_s5 }
  0x14   : > { %p770_p4 = scmp.lt.s32.totalorder %s761_s5, %s761_s5 }
  0x15   : > { %p752_p13 = pneg %p702_p12 }
  0x16   : > { %p771_p6 = por %p770_p4, %p769_p3 }
  0x17   : > { %p764_p1 = pnand %p762_p0, %p752_p13 }
  0x19   : > { %p765_p2 = pneg %p764_p1 }
  0x1b   : > { %p772_p7 = pnand %p771_p6, %p765_p2 }
  0x1d   : > { %775 = shalt.err (!%p772_p7)
}
  0x1e   : > { %s843_s6 = smov 256   ;;  %s844_s7 = smov 16  }
  0x1f   : > { %704 = dma.hbm_to_vmem [thread:$0]  (!%p702_p12), %s1038_s2, 6912, %s155_s30, [#allocation4], %s843_s6, %s843_s6, %s844_s7  }
  0x20   : > { %181 = sbr.rel (%p926_p10) target bundleno = 297 (0x129), region = 36 }
  0x25   : > { %819 = dma.done.wait (%p709_p9), [#allocation4], 6912  }
  0x26   : > { %821 = vsyncadd (%p709_p9), [#allocation4], 4294960384  ;;  %v845_v0 = vmov 0.0   ;;  %p207_p6 = scmp.lt.s32.totalorder %s898_s0, 1  ;;  %v251_v1 = vld [vmem:[#allocation3 + $0x118] sm:$0xff]  ;;  %v232_v2 = vld [vmem:[#allocation3 + $0x88] sm:$0xff] }
  0x27   : > { %330 = vmatprep.mubr.f32.mxu0 %v845_v0  ;;  %411 = vmatprep.mubr.f32.mxu1 %v845_v0  ;;  %v250_v3 = vld [vmem:[#allocation3 + $0x110] sm:$0xff]  ;;  %v231_v4 = vld [vmem:[#allocation3 + $0x80] sm:$0xff]  ;;  %v249_v5 = vld [vmem:[#allocation3 + $0x108] sm:$0xff]  ;;  %vm255_vm0 = vcmask 1046528   ;;  %vm261_vm1 = vcmask 588800   ;;  %vm443_vm2 = vcmask 1045504  }
  0x28   : > { %280 = vmatprep.subr.mxu0 %v251_v1  ;;  %361 = vmatprep.subr.mxu1 %v232_v2  ;;  %v230_v6 = vld [vmem:[#allocation3 + $0x78] sm:$0xff]  ;;  %s947_s10 = scalar_select %p207_p6, %s898_s0, 1  ;;  %v248_v7 = vld [vmem:[#allocation3 + $0x100] sm:$0xff]  ;;  %v229_v8 = vld [vmem:[#allocation3 + $0x70] sm:$0xff] }
  0x29   : > { %281 = vmatpush1.msra.mxu0 %v250_v3  ;;  %362 = vmatpush1.msra.mxu1 %v231_v4  ;;  %v247_v9 = vld [vmem:[#allocation3 + $0xf8] sm:$0xff]  ;;  %v228_v10 = vld [vmem:[#allocation3 + $0x68] sm:$0xff]  ;;  %v246_v11 = vld [vmem:[#allocation3 + $0xf0] sm:$0xff]  ;;  %s550_s15 = sld [smem:[#allocation2]]  ;;  %s204_s16 = sand.u32 1, %s832_s18  }
  0x2a   : > { %282 = vmatprep.subr.mxu0 %v249_v5  ;;  %363 = vmatprep.subr.mxu1 %v230_v6  ;;  %v227_v12 = vld [vmem:[#allocation3 + $0x60] sm:$0xff]  ;;  %v245_v13 = vld [vmem:[#allocation3 + $0xe8] sm:$0xff]  ;;  %v226_v14 = vld [vmem:[#allocation3 + $0x58] sm:$0xff]  ;;  %s694_s11 = smul.u32 24, %s947_s10  ;;  %v536_v5 = vlaneseq  ;;  %s662_s24 = sshll.u32 %s204_s16, 5 }
  0x2b   : > { %283 = vmatpush1.msra.mxu0 %v248_v7  ;;  %364 = vmatpush1.msra.mxu1 %v229_v8  ;;  %v244_v15 = vld [vmem:[#allocation3 + $0xe0] sm:$0xff]  ;;  %v225_v16 = vld [vmem:[#allocation3 + $0x50] sm:$0xff]  ;;  %v243_v17 = vld [vmem:[#allocation3 + $0xd8] sm:$0xff]  ;;  %s206_s28 = scalar_lea.vmem [#allocation6], %s662_s24  ;;  %s675_s30 = sshll.u32 %s898_s0, 9 }
  0x2c   : > { %284 = vmatprep.subr.mxu0 %v247_v9  ;;  %365 = vmatprep.subr.mxu1 %v228_v10  ;;  %v224_v18 = vld [vmem:[#allocation3 + $0x48] sm:$0xff]  ;;  %v242_v19 = vld [vmem:[#allocation3 + $0xd0] sm:$0xff]  ;;  %v223_v20 = vld [vmem:[#allocation3 + $0x40] sm:$0xff]  ;;  %s953_s14 = scalar_lea.vmem %s1037_s1, %s694_s11  ;;  %v537_v8 = vshrl.u32 %v536_v5, 7  ;;  %s582_s29 = sshll.u32 %s206_s28, 4  ;;  %s987_s29 = int_to_ptr.vmem [resolvable:$true] %s582_s29 }
  0x2d   : > { %285 = vmatpush1.msra.mxu0 %v246_v11  ;;  %366 = vmatpush1.msra.mxu1 %v227_v12  ;;  %v241_v21 = vld [vmem:[#allocation3 + $0xc8] sm:$0xff]  ;;  %v222_v22 = vld [vmem:[#allocation3 + $0x38] sm:$0xff]  ;;  %v240_v23 = vld [vmem:[#allocation3 + $0xc0] sm:$0xff]  ;;  %s992_s0 = scalar_lea.hbm %s1040_s4, %s675_s30  ;;  %s996_s7 = scalar_lea.sflag [#allocation5], %s204_s16 }
  0x2e   : > { %286 = vmatprep.subr.mxu0 %v245_v13  ;;  %367 = vmatprep.subr.mxu1 %v226_v14  ;;  %v221_v24 = vld [vmem:[#allocation3 + $0x30] sm:$0xff]  ;;  %v239_v25 = vld [vmem:[#allocation3 + $0xb8] sm:$0xff]  ;;  %v220_v26 = vld [vmem:[#allocation3 + $0x28] sm:$0xff]  ;;  %v538_v13 = vsub.s32 0, %v537_v8  ;;  %s776_s8 = scalar_lea.vmem %s987_s29, 512  ;;  %s846_s9 = smov [#allocation6]  }
  0x2f   : > { %287 = vmatpush1.msra.mxu0 %v244_v15  ;;  %368 = vmatpush1.msra.mxu1 %v225_v16  ;;  %v238_v27 = vld [vmem:[#allocation3 + $0xb0] sm:$0xff]  ;;  %v219_v28 = vld [vmem:[#allocation3 + $0x20] sm:$0xff]  ;;  %v237_v29 = vld [vmem:[#allocation3 + $0xa8] sm:$0xff]  ;;  %v542_v16 = vsub.s32 1, %v537_v8  ;;  %p777_p8 = scmp.ne.s32.totalorder %s987_s29, %s776_s8  ;;  %s780_s10 = sshll.u32 %s846_s9, 4  ;;  %s781_s10 = int_to_ptr.vmem [resolvable:$false] %s780_s10 }
  0x30   : > { %288 = vmatprep.subr.mxu0 %v243_v17  ;;  %369 = vmatprep.subr.mxu1 %v224_v18  ;;  %v218_v30 = vld [vmem:[#allocation3 + $0x18] sm:$0xff]  ;;  %v956_v31 = vld [vmem:[%s953_s14] sm:$0xff]  ;;  %v959_v32 = vld [vmem:[%s953_s14 + $0x8] sm:$0xff]  ;;  %s782_s11 = scalar_lea.vmem %s781_s10, 1024  ;;  %p783_p11 = scmp.lt.s32.totalorder %s987_s29, %s781_s10 }
  0x31   : > { %289 = vmatpush1.msra.mxu0 %v242_v19  ;;  %370 = vmatpush1.msra.mxu1 %v223_v20  ;;  %v236_v33 = vld [vmem:[#allocation3 + $0xa0] sm:$0xff]  ;;  %v217_v34 = vld [vmem:[#allocation3 + $0x10] sm:$0xff]  ;;  %v256_v35 = vrot.slane %v956_v31, 1  ;;  %v257_v36 = vrot.slane %v959_v32, 1  ;;  %v235_v37 = vld [vmem:[#allocation3 + $0x98] sm:$0xff]  ;;  %v444_v60 = vrot.slane %v956_v31, 2  ;;  %p778_p9 = pnand %p777_p8, %p915_p5  ;;  %p784_p12 = scmp.lt.s32.totalorder %s782_s11, %s776_s8 }
  0x32   : > { %290 = vmatprep.subr.mxu0 %v241_v21  ;;  %371 = vmatprep.subr.mxu1 %v222_v22  ;;  %v216_v38 = vld [vmem:[#allocation3 + $0x8] sm:$0xff]  ;;  %v234_v39 = vld [vmem:[#allocation3 + $0x90] sm:$0xff]  ;;  %v215_v40 = vld [vmem:[#allocation3] sm:$0xff]  ;;  %v445_v61 = vrot.slane %v959_v32, 2 }
  0x33   : > { %291 = vmatpush1.msra.mxu0 %v240_v23  ;;  %372 = vmatpush1.msra.mxu1 %v221_v24  ;;  %v258_v41 = vsel %vm255_vm0, %v256_v35, %v257_v36  ;;  %v442_v42 = vld [vmem:[#allocation3 + $0x1a8] sm:$0xff]  ;;  %v441_v43 = vld [vmem:[#allocation3 + $0x1a0] sm:$0xff]  ;;  %v440_v44 = vld [vmem:[#allocation3 + $0x198] sm:$0xff]  ;;  %p779_p10 = pneg %p778_p9  ;;  %p785_p13 = por %p784_p12, %p783_p11 }
  0x34   : > { %292 = vmatprep.subr.mxu0 %v239_v25  ;;  %373 = vmatprep.subr.mxu1 %v220_v26  ;;  %v439_v45 = vld [vmem:[#allocation3 + $0x190] sm:$0xff]  ;;  %v438_v46 = vld [vmem:[#allocation3 + $0x188] sm:$0xff]  ;;  %v437_v47 = vld [vmem:[#allocation3 + $0x180] sm:$0xff]  ;;  %v446_v3 = vsel %vm443_vm2, %v444_v60, %v445_v61  ;;  %v555_v26 = vstv %s550_s15 }
  0x35   : > { %293 = vmatpush1.msra.mxu0 %v238_v27  ;;  %374 = vmatpush1.msra.mxu1 %v219_v28  ;;  %v436_v48 = vld [vmem:[#allocation3 + $0x178] sm:$0xff]  ;;  %v214_v49 = vld [vmem:[%s953_s14 + $0x10] sm:$0x3]  ;;  %v434_v51 = vld [vmem:[#allocation3 + $0x168] sm:$0xff]  ;;  %p786_p0 = pnand %p785_p13, %p779_p10 }
  0x36   : > { %294 = vmatprep.subr.mxu0 %v237_v29  ;;  %375 = vmatprep.subr.mxu1 %v218_v30  ;;  %v435_v50 = vld [vmem:[#allocation3 + $0x170] sm:$0xff]  ;;  %v433_v52 = vld [vmem:[#allocation3 + $0x160] sm:$0xff]  ;;  %v259_v53 = vrot.slane %v214_v49, 1  ;;  %v432_v54 = vld [vmem:[#allocation3 + $0x158] sm:$0xff]  ;;  %v447_v62 = vrot.slane %v214_v49, 2 }
  0x37   : > { %295 = vmatpush1.msra.mxu0 %v236_v33  ;;  %376 = vmatpush1.msra.mxu1 %v217_v34  ;;  %v431_v55 = vld [vmem:[#allocation3 + $0x150] sm:$0xff]  ;;  %v430_v57 = vld [vmem:[#allocation3 + $0x148] sm:$0xff]  ;;  %v429_v58 = vld [vmem:[#allocation3 + $0x140] sm:$0xff] }
  0x38   : > { %296 = vmatprep.subr.mxu0 %v235_v37  ;;  %377 = vmatprep.subr.mxu1 %v216_v38  ;;  %v260_v56 = vsel %vm255_vm0, %v257_v36, %v259_v53  ;;  %v428_v59 = vld [vmem:[#allocation3 + $0x138] sm:$0xff]  ;;  %v427_v63 = vld [vmem:[#allocation3 + $0x130] sm:$0xff]  ;;  %v426_v1 = vld [vmem:[#allocation3 + $0x128] sm:$0xff]  ;;  %v448_v4 = vsel %vm443_vm2, %v445_v61, %v447_v62 }
  0x39   : > { %297 = vmatpush1.msra.mxu0 %v234_v39  ;;  %378 = vmatpush1.msra.mxu1 %v215_v40  ;;  %v425_v2 = vld [vmem:[#allocation3 + $0x120] sm:$0xff] }
  0x3a   : > { %664 = vmatmul.mubr.msk.f32.vlgmr.msra.gmra.mxu0 %vm261_vm1, %v258_v41  ;;  %666 = vmatmul.mubr.msk.f32.vlgmr.msra.gmra.mxu1 %vm261_vm1, %v956_v31 }
  0x3b   : > { %467 = vmatprep.subr.mxu0 %v442_v42  ;;  %676 = vmatprep.subr.mxu1 %v442_v42 }
  0x3c   : > { %468 = vmatpush1.msra.mxu0 %v441_v43  ;;  %685 = vmatpush1.msra.mxu1 %v441_v43 }
  0x3d   : > { %469 = vmatprep.subr.mxu0 %v440_v44  ;;  %677 = vmatprep.subr.mxu1 %v440_v44 }
  0x3e   : > { %470 = vmatpush1.msra.mxu0 %v439_v45  ;;  %686 = vmatpush1.msra.mxu1 %v439_v45 }
  0x3f   : > { %471 = vmatprep.subr.mxu0 %v438_v46  ;;  %678 = vmatprep.subr.mxu1 %v438_v46 }
  0x40   : > { %472 = vmatpush1.msra.mxu0 %v437_v47  ;;  %687 = vmatpush1.msra.mxu1 %v437_v47 }
  0x41   : > { %473 = vmatprep.subr.mxu0 %v436_v48  ;;  %679 = vmatprep.subr.mxu1 %v436_v48 }
  0x42   : > { %474 = vmatpush1.msra.mxu0 %v435_v50  ;;  %688 = vmatpush1.msra.mxu1 %v435_v50 }
  0x43   : > { %475 = vmatprep.subr.mxu0 %v434_v51  ;;  %680 = vmatprep.subr.mxu1 %v434_v51 }
  0x44   : > { %476 = vmatpush1.msra.mxu0 %v433_v52  ;;  %689 = vmatpush1.msra.mxu1 %v433_v52 }
  0x45   : > { %477 = vmatprep.subr.mxu0 %v432_v54  ;;  %681 = vmatprep.subr.mxu1 %v432_v54 }
  0x46   : > { %336 = vmatprep.mubr.f32.mxu0 %v845_v0  ;;  %417 = vmatprep.mubr.f32.mxu1 %v845_v0 }
  0x47   : > { %478 = vmatpush1.msra.mxu0 %v431_v55  ;;  %690 = vmatpush1.msra.mxu1 %v431_v55 }
  0x48   : > { %665 = vmatmul.mubr.msk.f32.gmra.mxu0 %vm261_vm1, %v260_v56  ;;  %667 = vmatmul.mubr.msk.f32.gmra.mxu1 %vm261_vm1, %v959_v32 }
  0x49   : > { %479 = vmatprep.subr.mxu0 %v430_v57  ;;  %682 = vmatprep.subr.mxu1 %v430_v57 }
  0x4a   : > { %480 = vmatpush1.msra.mxu0 %v429_v58  ;;  %691 = vmatpush1.msra.mxu1 %v429_v58 }
  0x4b   : > { %481 = vmatprep.subr.mxu0 %v428_v59  ;;  %683 = vmatprep.subr.mxu1 %v428_v59 }
  0x4c   : > { %482 = vmatpush1.msra.mxu0 %v427_v63  ;;  %692 = vmatpush1.msra.mxu1 %v427_v63 }
  0x4d   : > { %483 = vmatprep.subr.mxu0 %v426_v1  ;;  %684 = vmatprep.subr.mxu1 %v426_v1 }
  0x4e   : > { %484 = vmatpush1.msra.mxu0 %v425_v2  ;;  %693 = vmatpush1.msra.mxu1 %v425_v2 }
  0x4f   : > { %517 = vmatprep.mubr.f32.mxu0 %v845_v0  ;;  %523 = vmatprep.mubr.f32.mxu1 %v845_v0  ;;  %v534_v0 = vld [vmem:[%s1039_s3] sm:$0x3] }
  0x50   : > { %668 = vmatmul.mubr.msk.f32.vlgmr.msra.gmra.mxu0 %vm261_vm1, %v446_v3  ;;  %669 = vmatmul.mubr.msk.f32.vlgmr.msra.gmra.mxu1 %vm261_vm1, %v448_v4  ;;  %v539_v19 = vrot.slane %v534_v0, %v538_v13  ;;  %v543_v28 = vrot.slane %v534_v0, %v542_v16 }
  0xfa   : > { %v332_v6 = vpop.f32.mrf.mxu0  ;;  %v413_v7 = vpop.f32.mrf.mxu1 }
  0xfb   : > { %v414_v17 = vadd.f32 %v413_v7, %v332_v6 }
  0xfc   : > { %v334_v9 = vpop.f32.mrf.mxu0  ;;  %v415_v10 = vpop.f32.mrf.mxu1 }
  0xfd   : > { %v416_v22 = vadd.f32 %v415_v10, %v334_v9 }
 0x108   : > { %v338_v11 = vpop.f32.mrf.mxu0  ;;  %v419_v12 = vpop.f32.mrf.mxu1 }
 0x109   : > { %v420_v18 = vadd.f32 %v419_v12, %v338_v11 }
 0x10a   : > { %v340_v14 = vpop.f32.mrf.mxu0  ;;  %v421_v15 = vpop.f32.mrf.mxu1 }
 0x10b   : > { %v422_v23 = vadd.f32 %v421_v15, %v340_v14 }
 0x110   : > { %v519_v20 = vpop.f32.mrf.mxu0  ;;  %v525_v21 = vpop.f32.mrf.mxu1 }
 0x111   : > { %v530_v24 = vadd.f32 %v519_v20, %v414_v17  ;;  %v532_v25 = vadd.f32 %v525_v21, %v420_v18 }
 0x112   : > { %v521_v27 = vpop.f32.mrf.mxu0  ;;  %v527_v29 = vpop.f32.mrf.mxu1 }
 0x113   : > { %v546_v30 = vadd.f32 %v539_v19, %v530_v24  ;;  %v548_v31 = vadd.f32 %v539_v19, %v532_v25  ;;  %v531_v32 = vadd.f32 %v521_v27, %v416_v22  ;;  %v533_v33 = vadd.f32 %v527_v29, %v422_v23 }
 0x115   : > { %vm551_vm3 = vcmp.ge.f32.partialorder %v546_v30, 0.0  ;;  %v556_v34 = vmul.f32 %v555_v26, %v546_v30  ;;  %vm553_vm4 = vcmp.ge.f32.partialorder %v548_v31, 0.0  ;;  %v558_v35 = vmul.f32 %v555_v26, %v548_v31 }
 0x116   : > { %v547_v36 = vadd.f32 %v543_v28, %v531_v32  ;;  %v549_v37 = vadd.f32 %v543_v28, %v533_v33 }
 0x117   : > { %v560_v38 = vsel %vm551_vm3, %v546_v30, %v556_v34  ;;  %v562_v39 = vsel %vm553_vm4, %v548_v31, %v558_v35 }
 0x118   : > { %564 = vst [vmem:[%s206_s28] sm:$0xff] %v560_v38  ;;  %566 = vst [vmem:[%s206_s28 + $0x10] sm:$0xff] %v562_v39  ;;  %vm552_vm5 = vcmp.ge.f32.partialorder %v547_v36, 0.0  ;;  %v557_v40 = vmul.f32 %v555_v26, %v547_v36  ;;  %vm554_vm6 = vcmp.ge.f32.partialorder %v549_v37, 0.0  ;;  %v559_v41 = vmul.f32 %v555_v26, %v549_v37 }
 0x11a   : > { %v561_v42 = vsel %vm552_vm5, %v547_v36, %v557_v40  ;;  %v563_v43 = vsel %vm554_vm6, %v549_v37, %v559_v41 }
 0x11b   : > { %565 = vst [vmem:[%s206_s28 + $0x8] sm:$0xff] %v561_v42  ;;  %567 = vst [vmem:[%s206_s28 + $0x18] sm:$0xff] %v563_v43 }
 0x11c   : > { %789 = shalt.err (!%p786_p0)
}
 0x11d   : > { %s790_s12 = scalar_lea.hbm %s992_s0, 512  ;;  %s794_s15 = scalar_lea.hbm %s1040_s4, 1024 }
 0x11e   : > { %p791_p1 = scmp.ne.s32.totalorder %s992_s0, %s790_s12  ;;  %p795_p4 = scmp.lt.s32.totalorder %s992_s0, %s1040_s4 }
 0x11f   : > { %p796_p7 = scmp.lt.s32.totalorder %s794_s15, %s790_s12 }
 0x120   : > { %p792_p2 = pnand %p791_p1, %p915_p5 }
 0x121   : > { %p797_p6 = por %p796_p7, %p795_p4 }
 0x122   : > { %p793_p3 = pneg %p792_p2 }
 0x124   : > { %p798_p8 = pnand %p797_p6, %p793_p3 }
 0x126   : > { %801 = shalt.err (!%p798_p8)
}
 0x127   : > { %s847_s23 = smov 256   ;;  %s848_s24 = smov 16  }
 0x128   : > { %699 = dma.vmem_to_hbm [thread:$0]  (%p915_p5), %s987_s29, 512, %s992_s0, %s996_s7, %s847_s23, %s847_s23, %s848_s24  }
 0x129 PF: > { %p711_p9 = scmp.ge.s32.totalorder %s840_s20, 2  ;;  %s597_s28 = sand.u32 1, %s828_s17  }
 0x12a   : > { %p1044_p10 = scmp.ne.s32.totalorder %s1042_s27, 0  ;;  %s598_s30 = scalar_lea.sflag [#allocation5], %s597_s28 }
 0x12c   : > { %p706_p11 = pnand %p711_p9, %p1044_p10 }
 0x12e   : > { %p707_p12 = pneg %p706_p11 }
 0x130   : > { %823 = dma.done.wait (%p707_p12), %s598_s30, 512  }
 0x131   : > { %825 = vsyncadd (%p707_p12), %s598_s30, 4294966784  ;;  %p16_p13 = scmp.ge.s32.totalorder %s902_s22, 4   ;;  %s1045_s17 = smov %s832_s18 }
 0x132   : > { %s1046_s18 = smov %s836_s19  ;;  %s1047_s19 = smov %s913_s25 }
 0x133   : > { %s1048_s20 = smov %s902_s22  ;;  %18 = sbr.rel (!%p16_p13) target bundleno = 6 (0x6), region = 78 }
 0x138   :  { %603 = vsyncpa [#allocation4], 1 }
 0x139   :  { %605 = vsyncpa [#allocation4 + $0x1], 1 }
 0x13a   :  { %606 = vsyncpa [#allocation5], 1 }
 0x13b   :  { %608 = vsyncpa [#allocation5 + $0x1], 1 }

</bundles_post_ra>
